<compile_context>
chip_gen: v6e
topology: v6e:2x2x1
jax: 0.10.0
libtpu: 0.0.40
codegen_flags: <defaults>
</compile_context>

<pallas_src>
import math
import functools

import jax
import jax.numpy as jnp
from jax import lax
from jax.experimental import pallas as pl
from jax.experimental.pallas import tpu as pltpu


# ----------------------------------------------------------------------------
# helpers
# ----------------------------------------------------------------------------
def _vmem_capacity_bytes():
    try:
        return int(pltpu.get_tpu_info().vmem_capacity_bytes)
    except Exception:
        return 64 << 20          # conservative fallback (v7x per-TensorCore)


def _vmem_limit_bytes():
    """Scoped-VMEM limit handed to the compiler (leave headroom)."""
    return int(_vmem_capacity_bytes() * 3 // 4)


def _vmem_budget_bytes():
    """Explicit budget used for our own tile selection."""
    return int(_vmem_capacity_bytes() * 0.55)


def _tile(dim, pref, align):
    """Largest tile <= pref that is a multiple of `align` and divides `dim`
    (falls back to the full dim, which is always a legal block)."""
    if dim <= pref:
        return dim
    t = (pref // align) * align
    while t >= align:
        if dim % t == 0:
            return t
        t -= align
    return dim


# ----------------------------------------------------------------------------
# Tiled matmul + bias kernels (QKV projection and output projection)
# ----------------------------------------------------------------------------
def _matmul_bias_kernel_f32out(x_ref, w_ref, b_ref, o_ref, *, mxu_dtype):
    # f32 output block is resident across the k axis -> accumulate in place,
    # no VMEM acc scratch (matters most on v7x's 64 MiB VMEM).
    @pl.when(pl.program_id(2) == 0)
    def _():
        o_ref[...] = jnp.broadcast_to(b_ref[...].astype(jnp.float32),
                                      o_ref.shape)

    o_ref[...] += jnp.dot(x_ref[...].astype(mxu_dtype),
                          w_ref[...].astype(mxu_dtype),
                          preferred_element_type=jnp.float32)


def _matmul_bias_kernel_acc(x_ref, w_ref, b_ref, o_ref, acc_ref, *, mxu_dtype):
    @pl.when(pl.program_id(2) == 0)
    def _():
        acc_ref[...] = jnp.zeros_like(acc_ref)

    acc_ref[...] += jnp.dot(x_ref[...].astype(mxu_dtype),
                            w_ref[...].astype(mxu_dtype),
                            preferred_element_type=jnp.float32)

    @pl.when(pl.program_id(2) == pl.num_programs(2) - 1)
    def _():
        o_ref[...] = (acc_ref[...] + b_ref[...].astype(jnp.float32)
                      ).astype(o_ref.dtype)


def _matmul_tiles(M, N, K, in_itemsize, out_itemsize, budget):
    # Bigger tiles on 128 MiB parts (v5e/v6e); conservative on v7x (64 MiB/TC).
    if _vmem_capacity_bytes() >= (100 << 20):
        tm_pref, tn_pref, tk_pref = 512, 1024, 1024
    else:
        tm_pref, tn_pref, tk_pref = 256, 512, 512

    tm = _tile(M, tm_pref, 8)
    tn = _tile(N, tn_pref, 128)
    tk = _tile(K, tk_pref, 128)

    def usage(tm_, tn_, tk_):
        # double-buffered x / w / bias input blocks + output block + f32 acc
        return (2 * (tm_ * tk_ + tk_ * tn_ + tn_) * in_itemsize
                + 2 * tm_ * tn_ * out_itemsize
                + tm_ * tn_ * 4)

    for _ in range(8):                       # shrink until it fits the budget
        if usage(tm, tn, tk) <= budget:
            break
        if tk >= tn and tk > 128:
            tk = _tile(K, max(tk // 2, 128), 128)
        elif tn > 128:
            tn = _tile(N, max(tn // 2, 128), 128)
        elif tm > 8:
            tm = _tile(M, max(tm // 2, 8), 8)
        else:
            break
    return tm, tn, tk


def matmul_bias(x, w, b, *, mxu_dtype=jnp.bfloat16, out_dtype=None):
    """x:[M,K] @ w:[K,N] + b:[N] -> [M,N] (w stored as [in, out])."""
    M, K = x.shape
    K2, N = w.shape
    assert K == K2
    out_dtype = out_dtype or x.dtype
    out_itemsize = jnp.dtype(out_dtype).itemsize
    tm, tn, tk = _matmul_tiles(M, N, K, x.dtype.itemsize, out_itemsize,
                               _vmem_budget_bytes())
    grid = (M // tm, N // tn, K // tk)
    b2 = b.reshape(1, N)

    cost = pl.CostEstimate(
        flops=2 * M * N * K,
        transcendentals=0,
        # x is re-read once per N tile, w once per M tile.
        bytes_accessed=(M * K * (N // tn) + K * N * (M // tm)) * x.dtype.itemsize
        + M * N * out_itemsize + N * b.dtype.itemsize,
    )

    f32_out = jnp.dtype(out_dtype) == jnp.dtype(jnp.float32)
    if f32_out:
        kernel = functools.partial(_matmul_bias_kernel_f32out,
                                   mxu_dtype=mxu_dtype)
        scratch = []
    else:
        kernel = functools.partial(_matmul_bias_kernel_acc,
                                   mxu_dtype=mxu_dtype)
        scratch = [pltpu.VMEM((tm, tn), jnp.float32)]

    return pl.pallas_call(
        kernel,
        out_shape=jax.ShapeDtypeStruct((M, N), out_dtype),
        grid_spec=pltpu.PrefetchScalarGridSpec(
            num_scalar_prefetch=0,
            grid=grid,
            in_specs=[
                pl.BlockSpec((tm, tk), lambda i, j, k: (i, k)),   # x
                pl.BlockSpec((tk, tn), lambda i, j, k: (k, j)),   # w
                pl.BlockSpec((1, tn), lambda i, j, k: (0, j)),    # bias
            ],
            out_specs=pl.BlockSpec((tm, tn), lambda i, j, k: (i, j)),
            scratch_shapes=scratch,
        ),
        compiler_params=pltpu.CompilerParams(
            dimension_semantics=("parallel", "parallel", "arbitrary"),
            vmem_limit_bytes=_vmem_limit_bytes(),
        ),
        cost_estimate=cost,
    )(x, w, b2)


# ----------------------------------------------------------------------------
# One-shot rotary-embedding pass (hoisted out of the attention kv loop)
# ----------------------------------------------------------------------------
def _rotate_half(x):
    # Concat-form rotate_half.  This pass runs once per element (not in the
    # attention hot loop), so the slice/concat cost is negligible.
    half = x.shape[-1] // 2
    return jnp.concatenate([-x[:, half:], x[:, :half]], axis=-1)


def _rope_kernel(q_ref, k_ref, cos_ref, sin_ref, qo_ref, ko_ref, *, scale):
    cos = cos_ref[...]
    sin = sin_ref[...]
    q = q_ref[...].astype(jnp.float32)
    k = k_ref[...].astype(jnp.float32)
    # q is additionally pre-scaled by 1/sqrt(D) so the attention kernel needs
    # no per-step scaling multiply.
    qo_ref[...] = ((q * cos + _rotate_half(q) * sin) * scale).astype(qo_ref.dtype)
    ko_ref[...] = (k * cos + _rotate_half(k) * sin).astype(ko_ref.dtype)


def apply_rotary(q, k, cos, sin, *, scale, out_dtype):
    """q,k: [B*H, S, D]; cos/sin: [S, D].  Returns rotated (q*scale, k) in
    `out_dtype` (bf16 on the perf path -> halves attention q/k DMA bytes)."""
    BH, S, D = q.shape
    ts = _tile(S, 512, 8)
    grid = (BH, S // ts)

    return pl.pallas_call(
        functools.partial(_rope_kernel, scale=scale),
        out_shape=(jax.ShapeDtypeStruct((BH, S, D), out_dtype),
                   jax.ShapeDtypeStruct((BH, S, D), out_dtype)),
        grid_spec=pltpu.PrefetchScalarGridSpec(
            num_scalar_prefetch=0,
            grid=grid,
            in_specs=[
                pl.BlockSpec((None, ts, D), lambda b, i: (b, i, 0)),   # q
                pl.BlockSpec((None, ts, D), lambda b, i: (b, i, 0)),   # k
                pl.BlockSpec((ts, D), lambda b, i: (i, 0)),            # cos
                pl.BlockSpec((ts, D), lambda b, i: (i, 0)),            # sin
            ],
            out_specs=[
                pl.BlockSpec((None, ts, D), lambda b, i: (b, i, 0)),
                pl.BlockSpec((None, ts, D), lambda b, i: (b, i, 0)),
            ],
        ),
        compiler_params=pltpu.CompilerParams(
            dimension_semantics=("parallel", "parallel"),
            vmem_limit_bytes=_vmem_limit_bytes(),
        ),
    )(q, k, cos, sin)


# ----------------------------------------------------------------------------
# Flash attention (q/k already rotated; q pre-scaled)
# ----------------------------------------------------------------------------
def _attn_kernel(q_ref, k_ref, v_ref, o_ref, m_sc, l_sc, acc_sc, *, mxu_dtype):
    kv = pl.program_id(2)

    @pl.when(kv == 0)
    def _():
        m_sc[...] = jnp.full_like(m_sc, -jnp.inf)
        l_sc[...] = jnp.zeros_like(l_sc)
        acc_sc[...] = jnp.zeros_like(acc_sc)

    # scores [tq, tk]: contract head_dim of pre-rotated q and k (no transpose
    # copy).  MXU fed `mxu_dtype` operands, f32 accumulation.
    s = lax.dot_general(q_ref[...].astype(mxu_dtype),
                        k_ref[...].astype(mxu_dtype),
                        (((1,), (1,)), ((), ())),
                        preferred_element_type=jnp.float32)
    # TODO(synk): attn_mask support omitted (module forward called with None).

    m_new = jnp.maximum(m_sc[...], s.max(axis=-1, keepdims=True))
    alpha = jnp.exp(m_sc[...] - m_new)
    p = jnp.exp(s - m_new)                       # f32 softmax math
    l_sc[...] = alpha * l_sc[...] + p.sum(axis=-1, keepdims=True)
    acc_sc[...] = alpha * acc_sc[...] + jnp.dot(
        p.astype(mxu_dtype), v_ref[...].astype(mxu_dtype),
        preferred_element_type=jnp.float32)
    m_sc[...] = m_new

    @pl.when(kv == pl.num_programs(2) - 1)
    def _():
        # approx reciprocal runs on the EUP slot (off the VPU critical path).
        o_ref[...] = (acc_sc[...] * pl.reciprocal(l_sc[...], approx=True)
                      ).astype(o_ref.dtype)


def _attn_tiles(S, D, qk_itemsize, v_itemsize, out_itemsize, budget,
                tq_pref=256, tk_pref=512):
    tq = _tile(S, tq_pref, 8)
    tk = _tile(S, tk_pref, 8)

    def usage(tq_, tk_):
        return (2 * tq_ * D * qk_itemsize                    # q (dbl-buffered)
                + 2 * tk_ * D * (qk_itemsize + v_itemsize)   # k, v
                + 2 * tq_ * D * out_itemsize                 # out
                + tq_ * D * 4 + 2 * tq_ * 4)                 # acc / m / l

    for _ in range(8):
        if usage(tq, tk) <= budget:
            break
        if tk > 8:
            tk = _tile(S, max(tk // 2, 8), 8)
        elif tq > 8:
            tq = _tile(S, max(tq // 2, 8), 8)
        else:
            break
    return tq, tk


def flash_attention(q, k, v, *, mxu_dtype=jnp.bfloat16, out_dtype=None):
    """q,k: [B*H, S, D] already RoPE'd (q pre-scaled by 1/sqrt(D));
    v: [B*H, S, D].  Returns [B*H, S, D] in `out_dtype`."""
    BH, S, D = q.shape
    out_dtype = out_dtype or v.dtype
    out_itemsize = jnp.dtype(out_dtype).itemsize
    tq, tk = _attn_tiles(S, D, q.dtype.itemsize, v.dtype.itemsize,
                         out_itemsize, _vmem_budget_bytes())
    grid = (BH, S // tq, S // tk)

    cost = pl.CostEstimate(
        flops=4 * BH * S * S * D,
        transcendentals=BH * S * S,
        # k and v are re-streamed once per q tile; q/out touched once.
        bytes_accessed=BH * S * D * q.dtype.itemsize
        + BH * S * D * (S // tq) * (q.dtype.itemsize + v.dtype.itemsize)
        + BH * S * D * out_itemsize,
    )

    # NOTE: with D < 128 the last-dim blocks are lane-sparse; production
    # shapes should keep head_dim >= 128 (or pack heads) for dense stores.
    return pl.pallas_call(
        functools.partial(_attn_kernel, mxu_dtype=mxu_dtype),
        out_shape=jax.ShapeDtypeStruct((BH, S, D), out_dtype),
        grid_spec=pltpu.PrefetchScalarGridSpec(
            num_scalar_prefetch=0,
            grid=grid,
            in_specs=[
                pl.BlockSpec((None, tq, D), lambda b, i, j: (b, i, 0)),  # q
                pl.BlockSpec((None, tk, D), lambda b, i, j: (b, j, 0)),  # k
                pl.BlockSpec((None, tk, D), lambda b, i, j: (b, j, 0)),  # v
            ],
            out_specs=pl.BlockSpec((None, tq, D), lambda b, i, j: (b, i, 0)),
            scratch_shapes=[
                pltpu.VMEM((tq, 1), jnp.float32),   # running max
                pltpu.VMEM((tq, 1), jnp.float32),   # running denominator
                pltpu.VMEM((tq, D), jnp.float32),   # output accumulator
            ],
        ),
        compiler_params=pltpu.CompilerParams(
            dimension_semantics=("parallel", "parallel", "arbitrary"),
            vmem_limit_bytes=_vmem_limit_bytes(),
        ),
        cost_estimate=cost,
    )(q, k, v)


# ----------------------------------------------------------------------------
# Full module forward
# ----------------------------------------------------------------------------
def rotary_multihead_attention(x, wqkv, bqkv, wo, bo, num_heads,
                               mxu_dtype=jnp.bfloat16):
    """x: [B, S, E]; wqkv: [E, 3E] and wo: [E, E] stored pre-transposed.
    `mxu_dtype` selects the matmul operand precision (f32 accumulation)."""
    B, S, E = x.shape
    H = num_heads
    D = E // H
    T = B * S

    # 1) fused QKV projection (one MXU pass over the concatenated weight).
    qkv = matmul_bias(x.reshape(T, E), wqkv, bqkv, mxu_dtype=mxu_dtype)

    # 2) split heads: [B,S,3,H,D] -> q,k,v each [B*H, S, D].
    # TODO(synk): fold this split/merge into the attention BlockSpecs when
    #             D % 128 == 0 to avoid the two HBM transpose round trips.
    qkv = qkv.reshape(B, S, 3, H, D).transpose(2, 0, 3, 1, 4)
    q = qkv[0].reshape(B * H, S, D)
    k = qkv[1].reshape(B * H, S, D)
    v = qkv[2].reshape(B * H, S, D)

    # 3) rotary tables (tiny, computed once).
    inv_freq = 1.0 / (10000.0 ** (jnp.arange(0, D, 2, dtype=jnp.float32) / D))
    freqs = jnp.arange(S, dtype=jnp.float32)[:, None] * inv_freq[None, :]
    emb = jnp.concatenate([freqs, freqs], axis=-1)                  # [S, D]
    cos = jnp.cos(emb)
    sin = jnp.sin(emb)

    # 4) RoPE once per element (hoisted out of the attention kv loop); q is
    #    pre-scaled; outputs stored in the MXU dtype.
    q_r, k_r = apply_rotary(q, k, cos, sin, scale=1.0 / math.sqrt(D),
                            out_dtype=mxu_dtype)

    # 5) flash attention with online softmax (f32 softmax / accumulation).
    o = flash_attention(q_r, k_r, v, mxu_dtype=mxu_dtype, out_dtype=x.dtype)

    # 6) merge heads + output projection.
    o = o.reshape(B, H, S, D).transpose(0, 2, 1, 3).reshape(T, E)
    out = matmul_bias(o, wo, bo, mxu_dtype=mxu_dtype)
    # TODO(synk): dropout omitted (module in eval mode -> identity).
    return out.reshape(B, S, E)


# ----------------------------------------------------------------------------
# demo + reference check
# ----------------------------------------------------------------------------
if __name__ == "__main__":
    B, S, E, H = 2, 8, 32, 4
    D = E // H

    key = jax.random.PRNGKey(0)
    kx, k1, k2, k3, k4 = jax.random.split(key, 5)
    x = jax.random.normal(kx, (B, S, E), dtype=jnp.float32)

    def linear(kw, kb, fan_in, fan_out):
        bound = 1.0 / math.sqrt(fan_in)
        w = jax.random.uniform(kw, (fan_in, fan_out), jnp.float32, -bound, bound)
        b = jax.random.uniform(kb, (fan_out,), jnp.float32, -bound, bound)
        return w, b

    wqkv, bqkv = linear(k1, k2, E, 3 * E)
    wo, bo = linear(k3, k4, E, E)

    # perf path: bf16 MXU operands, f32 accumulation / softmax.
    out_bf16 = rotary_multihead_attention(x, wqkv, bqkv, wo, bo, num_heads=H)
    # reference-precision path: f32 MXU operands end-to-end.
    out_f32 = rotary_multihead_attention(x, wqkv, bqkv, wo, bo, num_heads=H,
                                         mxu_dtype=jnp.float32)
    out_bf16, out_f32 = jax.block_until_ready((out_bf16, out_f32))

    # -------- pure-JAX reference mirroring the PyTorch module --------
    x2d = x.reshape(B * S, E)
    qkv_ref = (x2d @ wqkv + bqkv).reshape(B, S, 3, H, D).transpose(2, 0, 3, 1, 4)
    q_r, k_r, v_r = qkv_ref[0], qkv_ref[1], qkv_ref[2]              # [B,H,S,D]

    inv_freq = 1.0 / (10000.0 ** (jnp.arange(0, D, 2, dtype=jnp.float32) / D))
    freqs = jnp.arange(S, dtype=jnp.float32)[:, None] * inv_freq[None, :]
    emb = jnp.concatenate([freqs, freqs], axis=-1)
    cos_r = jnp.cos(emb)[None, None]
    sin_r = jnp.sin(emb)[None, None]

    def rot_half(t):
        t1, t2 = t[..., : D // 2], t[..., D // 2:]
        return jnp.concatenate([-t2, t1], axis=-1)

    q_r = q_r * cos_r + rot_half(q_r) * sin_r
    k_r = k_r * cos_r + rot_half(k_r) * sin_r

    scores = jnp.einsum("bhqd,bhkd->bhqk", q_r, k_r) / math.sqrt(D)
    attn = jax.nn.softmax(scores, axis=-1)
    o_ref = jnp.einsum("bhqk,bhkd->bhqd", attn, v_r)
    o_ref = o_ref.transpose(0, 2, 1, 3).reshape(B * S, E)
    ref = (o_ref @ wo + bo).reshape(B, S, E)

    assert jnp.allclose(out_f32, ref, atol=1e-3, rtol=1e-3), \
        "f32 path mismatch vs reference"
    assert jnp.allclose(out_bf16, ref, atol=5e-2, rtol=5e-2), \
        "bf16-MXU path mismatch vs reference"
    print("KERNEL_OK")
</pallas_src>

<mosaic_0001>
module attributes {stable_mosaic.version = 11 : i64} {
  func.func @_matmul_bias_kernel_f32out(%arg0: i32, %arg1: i32, %arg2: i32, %arg3: memref<16x32xf32, #tpu.memory_space<vmem>>, %arg4: memref<32x96xf32, #tpu.memory_space<vmem>>, %arg5: memref<1x96xf32, #tpu.memory_space<vmem>>, %arg6: memref<16x96xf32, #tpu.memory_space<vmem>>) attributes {dimension_semantics = [#tpu.dimension_semantics<parallel>, #tpu.dimension_semantics<parallel>, #tpu.dimension_semantics<arbitrary>], iteration_bounds = array<i64: 1, 1, 1>, scalar_prefetch = 0 : i64, scratch_operands = 0 : i64, tpu.core_type = #tpu.core_type<tc>, window_params = [{transform_indices = @transform_0, window_bounds = array<i64: 16, 32>}, {transform_indices = @transform_1, window_bounds = array<i64: 32, 96>}, {transform_indices = @transform_2, window_bounds = array<i64: 1, 96>}, {transform_indices = @transform_3, window_bounds = array<i64: 16, 96>}]} {
    %c0_i32 = arith.constant 0 : i32
    %0 = arith.cmpi eq, %arg2, %c0_i32 : i32
    %1 = arith.extui %0 : i1 to i32
    %c0_i32_0 = arith.constant 0 : i32
    %2 = arith.cmpi ne, %1, %c0_i32_0 : i32
    scf.if %2 {
      %c0_8 = arith.constant 0 : index
      %c0_9 = arith.constant 0 : index
      %11 = vector.load %arg5[%c0_8, %c0_9] : memref<1x96xf32, #tpu.memory_space<vmem>>, vector<1x96xf32>
      %12 = vector.shape_cast %11 : vector<1x96xf32> to vector<1x96xf32>
      %13 = vector.broadcast %12 : vector<1x96xf32> to vector<16x96xf32>
      %c0_10 = arith.constant 0 : index
      %c0_11 = arith.constant 0 : index
      %14 = vector.load %arg6[%c0_10, %c0_11] : memref<16x96xf32, #tpu.memory_space<vmem>>, vector<16x96xf32>
      tpu.vector_store %arg6[%c0_10, %c0_11], %13 {strides = array<i32>} : memref<16x96xf32, #tpu.memory_space<vmem>>, vector<16x96xf32>,
    } else {
    }
    %c0 = arith.constant 0 : index
    %c0_1 = arith.constant 0 : index
    %3 = vector.load %arg6[%c0, %c0_1] : memref<16x96xf32, #tpu.memory_space<vmem>>, vector<16x96xf32>
    %c0_2 = arith.constant 0 : index
    %c0_3 = arith.constant 0 : index
    %4 = vector.load %arg3[%c0_2, %c0_3] : memref<16x32xf32, #tpu.memory_space<vmem>>, vector<16x32xf32>
    %5 = arith.truncf %4 : vector<16x32xf32> to vector<16x32xbf16>
    %c0_4 = arith.constant 0 : index
    %c0_5 = arith.constant 0 : index
    %6 = vector.load %arg4[%c0_4, %c0_5] : memref<32x96xf32, #tpu.memory_space<vmem>>, vector<32x96xf32>
    %7 = arith.truncf %6 : vector<32x96xf32> to vector<32x96xbf16>
    %cst = arith.constant dense<0.000000e+00> : vector<16x96xf32>
    %8 = tpu.matmul %5, %7, %cst {dimension_numbers = #tpu.dot_dimension_numbers<[1], [0], [0], [1], [0, 0, 1, 1], [], []>} : vector<16x32xbf16>, vector<32x96xbf16>, vector<16x96xf32> -> vector<16x96xf32>
    %9 = arith.addf %3, %8 : vector<16x96xf32>
    %c0_6 = arith.constant 0 : index
    %c0_7 = arith.constant 0 : index
    %10 = vector.load %arg6[%c0_6, %c0_7] : memref<16x96xf32, #tpu.memory_space<vmem>>, vector<16x96xf32>
    tpu.vector_store %arg6[%c0_6, %c0_7], %9 {strides = array<i32>} : memref<16x96xf32, #tpu.memory_space<vmem>>, vector<16x96xf32>,
    return
  }
  func.func @transform_0(%arg0: i32, %arg1: i32, %arg2: i32) -> (i32, i32) {
    %c0_i32 = arith.constant 0 : i32
    return %arg0, %arg2 : i32, i32
  }
  func.func @transform_1(%arg0: i32, %arg1: i32, %arg2: i32) -> (i32, i32) {
    %c0_i32 = arith.constant 0 : i32
    return %arg2, %arg1 : i32, i32
  }
  func.func @transform_2(%arg0: i32, %arg1: i32, %arg2: i32) -> (i32, i32) {
    %c0_i32 = arith.constant 0 : i32
    %c0_i32_0 = arith.constant 0 : i32
    return %c0_i32, %arg1 : i32, i32
  }
  func.func @transform_3(%arg0: i32, %arg1: i32, %arg2: i32) -> (i32, i32) {
    %c0_i32 = arith.constant 0 : i32
    return %arg0, %arg1 : i32, i32
  }
}

</mosaic_0001>

<bundles_post_ra>
// kernel: tpu_custom_call.1
= control target key start
LH: loop header
LB: loop body
LE: loop exit
PB: predicated region body
PF: predicated region fallthrough
CT: control target
= control target key end

     0   :  { %8 = vsyncpa [#allocation3], 0  ;;  %s275_s0 = inlined_call_operand.hbm [shape: f32[16,32], index: 0, kind: input, shape index: {}]   ;;  %s276_s1 = inlined_call_operand.hbm [shape: f32[32,96], index: 1, kind: input, shape index: {}]   ;;  %s277_s2 = inlined_call_operand.vmem [shape: f32[1,96], index: 2, kind: input, shape index: {}]   ;;  %s278_s3 = inlined_call_operand.hbm [shape: f32[16,96], index: 3, kind: output, shape index: {}]  }
   0x1   :  { %9 = vsyncpa [#allocation6], 0 }
   0x2   :  { %10 = vsyncpa [#allocation4], 0  ;;  %s223_s12 = smov [#allocation2]  }
   0x3   :  { %s16_s13 = sshll.u32 %s223_s12, 4  ;;  %s17_s13 = int_to_ptr.vmem [resolvable:$true] %s16_s13 }
   0x4   :  { %s165_s14 = scalar_lea.vmem %s17_s13, 256  ;;  %p170_p1 = scmp.lt.s32.totalorder %s17_s13, %s17_s13 }
   0x5   :  { %p166_p0 = scmp.ne.s32.totalorder %s17_s13, %s165_s14  ;;  %p171_p2 = scmp.lt.s32.totalorder %s165_s14, %s165_s14 }
   0x7   :  { %p172_p3 = por %p171_p2, %p170_p1 }
   0x9   :  { %p173_p4 = pnand %p172_p3, %p166_p0 }
   0xb   :  { %176 = shalt.err (!%p173_p4)
}
   0xc   :  { %s224_s15 = smov 128   ;;  %s225_s16 = smov 8  }
   0xd   :  { %22 = dma.hbm_to_vmem [thread:$0]  %s275_s0, 256, %s17_s13, [#allocation3], %s224_s15, %s224_s15, %s225_s16  }
   0xe   :  { %s226_s19 = smov [#allocation5]  }
   0xf   :  { %s28_s20 = sshll.u32 %s226_s19, 4  ;;  %s29_s20 = int_to_ptr.vmem [resolvable:$true] %s28_s20 }
  0x10   :  { %s185_s21 = scalar_lea.vmem %s29_s20, 512  ;;  %p190_p6 = scmp.lt.s32.totalorder %s29_s20, %s29_s20 }
  0x11   :  { %p186_p5 = scmp.ne.s32.totalorder %s29_s20, %s185_s21  ;;  %p191_p7 = scmp.lt.s32.totalorder %s185_s21, %s185_s21 }
  0x13   :  { %p192_p8 = por %p191_p7, %p190_p6 }
  0x15   :  { %p193_p9 = pnand %p192_p8, %p186_p5 }
  0x17   :  { %196 = shalt.err (!%p193_p9)
}
  0x18   :  { %34 = dma.hbm_to_vmem [thread:$0]  %s276_s1, 512, %s29_s20, [#allocation6], %s224_s15, %s224_s15, %s225_s16  }
  0x19   :  { %217 = dma.done.wait [#allocation3], 256  }
  0x1a   :  { %218 = vsyncadd [#allocation3], 4294967040 }
  0x1b   :  { %219 = dma.done.wait [#allocation6], 512  }
  0x1c   :  { %220 = vsyncadd [#allocation6], 4294966784  ;;  %v227_v0 = vmov 0.0   ;;  %vm228_vm0 = vmmov 0   ;;  %v65_v1 = vld [vmem:[#allocation5 + $0x10] sm:$0xff]  ;;  %v66_v2 = vld [vmem:[#allocation5 + $0x18] sm:$0xff] }
  0x1d   :  { %142 = vmatprep.subr.bf16.mxu0 %v227_v0  ;;  %146 = vmatprep.mubr.msk.bf16.mxu0 %vm228_vm0, %v227_v0  ;;  %v63_v3 = vld [vmem:[#allocation5] sm:$0xff]  ;;  %vm55_vm1 = vcmask 785408   ;;  %v68_v4 = vpack.c.bf16 %v66_v2, %v65_v1  ;;  %v64_v5 = vld [vmem:[#allocation5 + $0x8] sm:$0xff]  ;;  %v137_v6 = vld [vmem:[%s277_s2] ss:$0 sm:$0xff]  ;;  %vm69_vm2 = vcmask 261120  }
  0x1e   :  { %v67_v7 = vpack.c.bf16 %v64_v5, %v63_v3  ;;  %v60_v8 = vld [vmem:[#allocation2] sm:$0xff]  ;;  %v61_v9 = vld [vmem:[#allocation2 + $0x8] sm:$0xff]  ;;  %56 = vst.msk [vmem:[#allocation7] sm:$0xff] %vm55_vm1, %v137_v6  ;;  %57 = vst.msk [vmem:[#allocation7 + $0x8] sm:$0xff] %vm55_vm1, %v137_v6  ;;  %s229_s1 = smov [#allocation7]  }
  0x1f   :  { %143 = vmatpush3.bf16.msra.mxu0 %v68_v4  ;;  %v62_v10 = vpack.c.bf16 %v61_v9, %v60_v8  ;;  %s124_s2 = sshll.u32 %s229_s1, 4  ;;  %s125_s2 = int_to_ptr.vmem [resolvable:$true] %s124_s2 }
  0x20   :  { %144 = vmatprep.subr.bf16.mxu0 %v227_v0  ;;  %s197_s25 = scalar_lea.vmem %s125_s2, 256  ;;  %p202_p11 = scmp.lt.s32.totalorder %s125_s2, %s125_s2 }
  0x21   :  { %p198_p10 = scmp.ne.s32.totalorder %s125_s2, %s197_s25  ;;  %p203_p12 = scmp.lt.s32.totalorder %s197_s25, %s197_s25 }
  0x23   :  { %145 = vmatpush3.bf16.msra.mxu0 %v67_v7  ;;  %p204_p13 = por %p203_p12, %p202_p11 }
  0x25   :  { %v58_v11 = vld [vmem:[#allocation7] sm:$0xff]  ;;  %v59_v15 = vld [vmem:[#allocation7 + $0x8] sm:$0xff]  ;;  %p205_p0 = pnand %p204_p13, %p198_p10 }
  0x26   :  { %147 = vmatmul.mubr.msk.bf16.vlgmr.msra.gmra.mxu0 %vm69_vm2, %v62_v10 }
  0xe6   :  { %v107_v12 = vpop.f32.mrf.mxu0 }
  0xe7   :  { %v114_v13 = vadd.f32 %v107_v12, %v58_v11 }
  0xe8   :  { %v148_v14 = vpop.f32.mrf.mxu0 }
  0xe9   :  { %117 = vst.msk [vmem:[#allocation7] sm:$0xff] %vm55_vm1, %v114_v13 }
  0xea   :  { %v110_v16 = vpop.f32.mrf.mxu0 }
  0xeb   :  { %v115_v17 = vadd.f32 %v110_v16, %v59_v15 }
  0xec   :  { %v149_v18 = vpop.f32.mrf.mxu0 }
  0xed   :  { %118 = vst.msk [vmem:[#allocation7 + $0x8] sm:$0xff] %vm55_vm1, %v115_v17 }
  0xee   :  { %208 = shalt.err (!%p205_p0)
}
  0xef   :  { %130 = dma.vmem_to_hbm [thread:$0]  %s125_s2, 256, %s278_s3, [#allocation4], %s224_s15, %s224_s15, %s225_s16  }
  0xf0   :  { %221 = dma.done.wait [#allocation4], 256  }
  0xf1   :  { %222 = vsyncadd [#allocation4], 4294967040 }
  0xf2   :  { %134 = vsyncpa [#allocation3], 1 }
  0xf3   :  { %135 = vsyncpa [#allocation6], 1 }
  0xf4   :  { %136 = vsyncpa [#allocation4], 1 }

</bundles_post_ra>
